<compile_context>
chip_gen: v7x
topology: tpu7x:2x2x1
jax: 0.10.0
libtpu: 0.0.40
codegen_flags: <defaults>
</compile_context>

<pallas_src>
import jax
import jax.numpy as jnp
from jax.experimental import pallas as pl
from jax.experimental.pallas import tpu as pltpu

_LANE = 128


def _bias_kernel(alpha_ref, beta_ref, x_ref, o_ref):
    # alpha/beta live in SMEM as (1,) f32 scalars; compute in f32, cast on store.
    a = alpha_ref[0]
    b = beta_ref[0]
    y = a * x_ref[...].astype(jnp.float32) + b
    o_ref[...] = y.astype(o_ref.dtype)


def _sublane_multiple(dtype):
    # Native sublane packing: f32 -> 8 rows, bf16/f16 -> 16, int8/fp8 -> 32.
    itemsize = jnp.dtype(dtype).itemsize
    return 8 * max(1, 4 // itemsize)


def _round_up(v, m):
    return ((v + m - 1) // m) * m


def bias_layer(x, alpha, beta, *, target_block_bytes=4 * 1024 * 1024):
    """Apply y = alpha * x + beta elementwise via a Pallas TPU kernel.

    x: any shape (NCHW here). alpha, beta: shape (1,) float32 params.
    """
    orig_shape = x.shape
    dtype = x.dtype
    total = x.size
    itemsize = jnp.dtype(dtype).itemsize
    sub = _sublane_multiple(dtype)

    x_flat = x.reshape(-1)
    padded_total = total
    if total % _LANE != 0:
        # Only a sub-128-element remainder reaches this path now.
        # TODO(synk): handle the <128-element tail in-kernel (manual ragged DMA)
        # instead of this host-side pad + slice.
        padded_total = _round_up(total, _LANE)
        x_flat = jnp.pad(x_flat, (0, padded_total - total))

    rows = padded_total // _LANE
    row_bytes = _LANE * itemsize
    total_bytes = padded_total * itemsize

    # Rows per block from the byte target, rounded to the dtype's sublane packing.
    block_rows = max(sub, (target_block_bytes // row_bytes) // sub * sub)

    # Mid/large tensors: force >= 4 blocks so the DMA pipeline has work to
    # overlap and both TensorCores get used on v7x.
    if total_bytes >= 512 * 1024:
        cap = max(sub, (rows // 4) // sub * sub)
        block_rows = min(block_rows, cap)

    # Never make the block larger than the array (full-extent block if tiny).
    block_rows = min(block_rows, rows)

    num_blocks = pl.cdiv(rows, block_rows)  # ragged final block is masked by Pallas
    x2d = x_flat.reshape(rows, _LANE)

    out2d = pl.pallas_call(
        _bias_kernel,
        out_shape=jax.ShapeDtypeStruct((rows, _LANE), dtype),
        grid_spec=pltpu.PrefetchScalarGridSpec(
            num_scalar_prefetch=0,
            grid=(num_blocks,),
            in_specs=[
                pl.BlockSpec(memory_space=pltpu.MemorySpace.SMEM),   # alpha (1,) f32
                pl.BlockSpec(memory_space=pltpu.MemorySpace.SMEM),   # beta  (1,) f32
                pl.BlockSpec((block_rows, _LANE), lambda i: (i, 0)),
            ],
            out_specs=pl.BlockSpec((block_rows, _LANE), lambda i: (i, 0)),
        ),
        compiler_params=pltpu.CompilerParams(
            # Shards the block axis across the 2 TensorCores on v7x (no-op on
            # single-TC v5e/v6e).
            dimension_semantics=("parallel",),
            # Explicit limit: 4 MiB blocks double-buffered for in + out = 16 MiB
            # plus headroom; within physical VMEM on all of v5e/v6e/v7x.
            vmem_limit_bytes=32 * 1024 * 1024,
        ),
    )(alpha.astype(jnp.float32), beta.astype(jnp.float32), x2d)

    out_flat = out2d.reshape(-1)
    if padded_total != total:
        out_flat = out_flat[:total]
    return out_flat.reshape(orig_shape)


if __name__ == "__main__":
    key = jax.random.PRNGKey(0)

    # Deterministic parameter init matching BiasLayer.__init__:
    # alpha = ones(1), beta = zeros(1)
    alpha = jnp.ones((1,), dtype=jnp.float32)
    beta = jnp.zeros((1,), dtype=jnp.float32)

    # Primary case: small NCHW input consistent with a conv-style module.
    x = jax.random.normal(key, (2, 4, 16, 16), dtype=jnp.float32)
    y = jax.block_until_ready(bias_layer(x, alpha, beta))
    ref = alpha[0] * x + beta[0]
    assert y.shape == x.shape and y.dtype == x.dtype
    assert jnp.allclose(y, ref, atol=1e-6), "mismatch vs reference (primary)"

    # Multi-block case (>= 512 KiB -> >= 4 grid steps): exercises the pipeline.
    k2 = jax.random.PRNGKey(1)
    x2 = jax.random.normal(k2, (4, 32, 32, 32), dtype=jnp.float32)
    y2 = jax.block_until_ready(bias_layer(x2, alpha, beta))
    assert jnp.allclose(y2, alpha[0] * x2 + beta[0], atol=1e-6), "mismatch (multi-block)"

    # Ragged case (size not a multiple of 128): exercises the tail fallback.
    k3 = jax.random.PRNGKey(2)
    x3 = jax.random.normal(k3, (2, 3, 10, 10), dtype=jnp.float32)
    y3 = jax.block_until_ready(bias_layer(x3, alpha, beta))
    assert jnp.allclose(y3, alpha[0] * x3 + beta[0], atol=1e-6), "mismatch (ragged)"

    print("KERNEL_OK")
</pallas_src>

<mosaic_0001>
module attributes {stable_mosaic.version = 11 : i64} {
  func.func @_bias_kernel(%arg0: i32, %arg1: memref<1xf32, #tpu.memory_space<smem>>, %arg2: memref<1xf32, #tpu.memory_space<smem>>, %arg3: memref<16x128xf32, #tpu.memory_space<vmem>>, %arg4: memref<16x128xf32, #tpu.memory_space<vmem>>) attributes {dimension_semantics = [#tpu.dimension_semantics<parallel>], iteration_bounds = array<i64: 1>, scalar_prefetch = 0 : i64, scratch_operands = 0 : i64, tpu.core_type = #tpu.core_type<tc>, window_params = [{transform_indices = @transform_0, window_bounds = array<i64: 1>}, {transform_indices = @transform_1, window_bounds = array<i64: 1>}, {transform_indices = @transform_2, window_bounds = array<i64: 16, 128>}, {transform_indices = @transform_3, window_bounds = array<i64: 16, 128>}]} {
    %c0 = arith.constant 0 : index
    %0 = memref.load %arg1[%c0] : memref<1xf32, #tpu.memory_space<smem>>
    %c0_0 = arith.constant 0 : index
    %1 = memref.load %arg2[%c0_0] : memref<1xf32, #tpu.memory_space<smem>>
    %c0_1 = arith.constant 0 : index
    %c0_2 = arith.constant 0 : index
    %2 = vector.load %arg3[%c0_1, %c0_2] : memref<16x128xf32, #tpu.memory_space<vmem>>, vector<16x128xf32>
    %3 = vector.broadcast %0 : f32 to vector<16x128xf32>
    %4 = arith.mulf %3, %2 : vector<16x128xf32>
    %5 = vector.broadcast %1 : f32 to vector<16x128xf32>
    %6 = arith.addf %4, %5 : vector<16x128xf32>
    %c0_3 = arith.constant 0 : index
    %c0_4 = arith.constant 0 : index
    %7 = vector.load %arg4[%c0_3, %c0_4] : memref<16x128xf32, #tpu.memory_space<vmem>>, vector<16x128xf32>
    tpu.vector_store %arg4[%c0_3, %c0_4], %6 {strides = array<i32>} : memref<16x128xf32, #tpu.memory_space<vmem>>, vector<16x128xf32>,
    return
  }
  func.func @transform_0(%arg0: i32) -> i32 {
    %c0_i32 = arith.constant 0 : i32
    %c0_i32_0 = arith.constant 0 : i32
    return %c0_i32 : i32
  }
  func.func @transform_1(%arg0: i32) -> i32 {
    %c0_i32 = arith.constant 0 : i32
    %c0_i32_0 = arith.constant 0 : i32
    return %c0_i32 : i32
  }
  func.func @transform_2(%arg0: i32) -> (i32, i32) {
    %c0_i32 = arith.constant 0 : i32
    %c0_i32_0 = arith.constant 0 : i32
    return %arg0, %c0_i32 : i32, i32
  }
  func.func @transform_3(%arg0: i32) -> (i32, i32) {
    %c0_i32 = arith.constant 0 : i32
    %c0_i32_0 = arith.constant 0 : i32
    return %arg0, %c0_i32 : i32, i32
  }
}

</mosaic_0001>

<bundles_post_ra>
// kernel: tpu_custom_call.1
= control target key start
LH: loop header
LB: loop body
LE: loop exit
PB: predicated region body
PF: predicated region fallthrough
CT: control target
= control target key end

     0   :  { %10 = vsyncpa [#allocation5], 0  ;;  %s172_s0 = inlined_call_operand.<no memory space> [shape: f32[1], index: 0, kind: input, shape index: {}]   ;;  %s173_s1 = inlined_call_operand.<no memory space> [shape: f32[1], index: 1, kind: input, shape index: {}]   ;;  %s174_s2 = inlined_call_operand.hbm [shape: f32[16,128], index: 2, kind: input, shape index: {}]   ;;  %s175_s3 = inlined_call_operand.hbm [shape: f32[16,128], index: 3, kind: output, shape index: {}]  }
   0x1   :  { %11 = vsyncpa [#allocation6], 0  ;;  %s112_s12 = smov [#allocation4]   ;;  %s64_s16 = scalar_lea.hbm %s174_s2, 256 }
   0x2   :  { %s21_s13 = sshll.u32 %s112_s12, 4  ;;  %p65_p0 = scmp.ne.s32.totalorder %s174_s2, %s64_s16  ;;  %s22_s13 = int_to_ptr.vmem [resolvable:$true] %s21_s13 }
   0x3   :  { %p68_p1 = scmp.lt.u32.totalorder %s64_s16, %s174_s2 }
   0x5   :  { %p70_p2 = pnand %p68_p1, %p65_p0 }
   0x7   :  { %73 = shalt.err (!%p70_p2)
}
   0x8   :  { %s74_s21 = scalar_lea.vmem %s22_s13, 256  ;;  %p79_p4 = scmp.lt.s32.totalorder %s22_s13, %s22_s13 }
   0x9   :  { %p75_p3 = scmp.ne.s32.totalorder %s22_s13, %s74_s21  ;;  %p80_p5 = scmp.lt.s32.totalorder %s74_s21, %s74_s21 }
   0xb   :  { %p81_p6 = por %p80_p5, %p79_p4 }
   0xd   :  { %p82_p7 = pnand %p81_p6, %p75_p3 }
   0xf   :  { %85 = shalt.err (!%p82_p7)
}
  0x10   :  { %s113_s22 = smov 128   ;;  %s114_s23 = smov 8  }
  0x11   :  { %27 = dma.hbm_to_vmem [thread:$0]  %s174_s2, 256, %s22_s13, [#allocation5], %s113_s22, %s113_s22, %s114_s23  }
  0x12   :  { %108 = dma.done.wait [#allocation5], 256  }
  0x13   :  { %109 = vsyncadd [#allocation5], 4294967040  ;;  %v35_v0 = vstv %s172_s0  ;;  %v33_v1 = vld [vmem:[#allocation4] sm:$0xff]  ;;  %v38_v2 = vstv %s173_s1  ;;  %v34_v3 = vld [vmem:[#allocation4 + $0x8] sm:$0xff]  ;;  %s115_s30 = smov [#allocation7]  }
  0x14   :  { %s48_s4 = sshll.u32 %s115_s30, 4  ;;  %v36_v4 = vmul.f32 %v35_v0, %v33_v1  ;;  %v37_v5 = vmul.f32 %v35_v0, %v34_v3  ;;  %s49_s4 = int_to_ptr.vmem [resolvable:$true] %s48_s4 }
  0x15   :  { %s86_s2 = scalar_lea.vmem %s49_s4, 256  ;;  %p91_p9 = scmp.lt.s32.totalorder %s49_s4, %s49_s4 }
  0x16   :  { %v39_v6 = vadd.f32 %v38_v2, %v36_v4  ;;  %v40_v7 = vadd.f32 %v38_v2, %v37_v5  ;;  %p87_p8 = scmp.ne.s32.totalorder %s49_s4, %s86_s2  ;;  %p92_p10 = scmp.lt.s32.totalorder %s86_s2, %s86_s2 }
  0x18   :  { %41 = vst [vmem:[#allocation7] sm:$0xff] %v39_v6  ;;  %42 = vst [vmem:[#allocation7 + $0x8] sm:$0xff] %v40_v7  ;;  %p93_p11 = por %p92_p10, %p91_p9 }
  0x1a   :  { %p94_p12 = pnand %p93_p11, %p87_p8 }
  0x1c   :  { %97 = shalt.err (!%p94_p12)
}
  0x1d   :  { %s98_s1 = scalar_lea.hbm %s175_s3, 256 }
  0x1e   :  { %p99_p13 = scmp.ne.s32.totalorder %s175_s3, %s98_s1  ;;  %p102_p0 = scmp.lt.u32.totalorder %s98_s1, %s175_s3 }
  0x20   :  { %p104_p1 = pnand %p102_p0, %p99_p13 }
  0x22   :  { %107 = shalt.err (!%p104_p1)
}
  0x23   :  { %54 = dma.vmem_to_hbm [thread:$0]  %s49_s4, 256, %s175_s3, [#allocation6], %s113_s22, %s113_s22, %s114_s23  }
  0x24   :  { %110 = dma.done.wait [#allocation6], 256  }
  0x25   :  { %111 = vsyncadd [#allocation6], 4294967040 }
  0x26   :  { %58 = vsyncpa [#allocation5], 1 }
  0x27   :  { %59 = vsyncpa [#allocation6], 1 }

</bundles_post_ra>
